<compile_context>
chip_gen: v5e
topology: v5e:2x2
jax: 0.10.0
libtpu: 0.0.40
codegen_flags: <defaults>
</compile_context>

<pallas_src>
import functools

import jax
import jax.numpy as jnp
from jax.experimental import pallas as pl
from jax.experimental.pallas import tpu as pltpu


def _round_up(x, m):
    return (x + m - 1) // m * m


def _cdiv(a, b):
    return -(-a // b)


@functools.lru_cache(maxsize=None)
def _vmem_budget_and_limit():
    """Generation-aware VMEM sizing (v5e/v6e: 128 MiB physical, v7x: 64 MiB)."""
    try:
        cap = int(pltpu.get_tpu_info().vmem_capacity_bytes)
    except Exception:
        cap = 64 * 1024 * 1024  # conservative fallback == v7x per-core VMEM
    # Leave headroom for Mosaic internal scratch / semaphores.
    limit = max(32 * 1024 * 1024, min(int(cap * 0.75), cap - 16 * 1024 * 1024))
    budget = int(limit * 0.9)   # what the tile chooser plans against
    return budget, limit


def _l2_normalize(x):
    # Row-wise x / (||x||_2 + 1e-6); approx reciprocal on the EUP slot + one
    # Newton step on the [tile_b, 1] column to recover ~f32 accuracy.
    norm = jnp.sqrt(jnp.sum(x * x, axis=1, keepdims=True)) + 1e-6
    inv = pl.reciprocal(norm, approx=True)
    inv = inv * (2.0 - norm * inv)
    return x * inv


def sage_kernel(x_ref, w_ref, b_ref, scale_ref, shift_ref, o_ref, *, n_tiles, tile_n):
    # x_ref : [TILE_B, 2*Din]   gathered [self || aggregated] features (compute dtype)
    # w_ref : [2*Din, TILE_N]   linear weight block (single K=2*Din matmul)
    # b_ref / scale_ref / shift_ref : [1, TILE_N]   bias + folded eval-BN affine (f32)
    # o_ref : [TILE_B, Dout_pad] full-width output block, resident across the N axis
    acc = jnp.dot(x_ref[...], w_ref[...], preferred_element_type=jnp.float32)
    out = jnp.maximum(acc + b_ref[...], 0.0)        # Linear bias + ReLU
    out = out * scale_ref[...] + shift_ref[...]     # BatchNorm1d (eval, folded affine)
    # Dropout (eval mode) = identity.

    if n_tiles == 1:
        # Whole output row is available in registers: normalize directly.
        o_ref[...] = _l2_normalize(out).astype(o_ref.dtype)
    else:
        j = pl.program_id(1)
        col0 = pl.multiple_of(j * tile_n, tile_n)
        o_ref[:, pl.ds(col0, tile_n)] = out.astype(o_ref.dtype)

        # All Dout columns of this batch tile are now in the resident VMEM block.
        @pl.when(j == n_tiles - 1)
        def _():
            o_ref[...] = _l2_normalize(o_ref[...].astype(jnp.float32)).astype(o_ref.dtype)


def _choose_tiles(b_rows, k_dim, d_out, in_itemsize, out_itemsize, budget,
                  const_weight_bufs, min_n_tiles=1, num_cores=2):
    """Pick (tile_b, tile_n, n_tiles, d_out_pad) that fit the VMEM budget."""
    row_align = 16 if in_itemsize < 4 else 8   # bf16 sublane packing needs 16 rows

    def footprint(tile_b, tile_n, n_tiles):
        w_bufs = const_weight_bufs if n_tiles == 1 else 2
        x_bytes = 2 * tile_b * k_dim * in_itemsize                 # dbl-buffered activations
        w_bytes = w_bufs * k_dim * tile_n * in_itemsize             # weight block(s)
        o_bytes = 2 * tile_b * tile_n * n_tiles * out_itemsize      # dbl-buffered full-width out
        p_bytes = 3 * w_bufs * max(tile_n, 128) * 4                 # bias / scale / shift
        return x_bytes + w_bytes + o_bytes + p_bytes

    # 1) Weight (N) tiling: stream [2*Din, tile_n] blocks once they stop fitting.
    n_tiles = max(1, int(min_n_tiles))
    tile_n = _round_up(_cdiv(d_out, n_tiles), 128)
    while n_tiles < 1024 and footprint(row_align, tile_n, n_tiles) > budget:
        n_tiles *= 2
        tile_n = _round_up(_cdiv(d_out, n_tiles), 128)
    d_out_pad = tile_n * n_tiles

    # 2) Batch tiling: big tiles amortize the ~0.35us per-grid-step overhead, but keep
    #    >= 2*num_cores steps so both v7x TensorCores work and DMA overlaps compute.
    target_steps = 2 * num_cores
    tile_b = max(row_align,
                 min(2048, _round_up(_cdiv(b_rows, target_steps), row_align)))
    while tile_b > row_align and footprint(tile_b, tile_n, n_tiles) > budget:
        tile_b = max(row_align, _round_up(tile_b // 2, row_align))
    return tile_b, tile_n, n_tiles, d_out_pad


def _const_spec(block_shape, index_map, mode):
    # Only touch pipeline_mode when we actually want non-default buffering, so the
    # fallback path never depends on the kwarg existing.
    if mode is None:
        return pl.BlockSpec(block_shape, index_map)
    return pl.BlockSpec(block_shape, index_map, pipeline_mode=mode)


@functools.partial(
    jax.jit,
    static_argnames=("compute_dtype", "out_dtype", "single_buffer_consts", "min_n_tiles"))
def _forward(features, batch, edge_index, params, *, compute_dtype, out_dtype,
             single_buffer_consts, min_n_tiles):
    w, b, gamma, beta, run_mean, run_var = params
    n_nodes, d_in = features.shape
    b_rows = batch.shape[0]
    d_out = w.shape[1]
    k_dim = 2 * d_in

    sources, targets = edge_index[0], edge_index[1]
    # scatter(features[targets], sources, dim=0, dim_size=N): data-dependent
    # scatter-add stays in XLA (matches the PyTorch spec's message direction).
    aggregated = jnp.zeros((n_nodes, d_in), features.dtype).at[sources].add(features[targets])

    # Gather + concat into one [B, 2*Din] slab: a single K=2*Din MXU matmul per tile
    # (one weight push, deeper K) instead of two K=Din matmuls.
    x = jnp.concatenate([features[batch], aggregated[batch]], axis=1)

    # Fold eval-mode BatchNorm into one affine: y = x*scale + shift.
    scale = gamma * jax.lax.rsqrt(run_var + 1e-5)
    shift = beta - run_mean * scale

    in_itemsize = jnp.dtype(compute_dtype).itemsize
    out_itemsize = jnp.dtype(out_dtype).itemsize
    budget, vmem_limit = _vmem_budget_and_limit()
    tile_b, tile_n, n_tiles, d_out_pad = _choose_tiles(
        b_rows, k_dim, d_out, in_itemsize, out_itemsize, budget,
        const_weight_bufs=1 if single_buffer_consts else 2,
        min_n_tiles=min_n_tiles)

    # Lane-dense, zero-padded output columns: padded lanes carry zero weight / bias /
    # scale / shift, so they are exactly 0 and do not perturb the row-wise L2 norm.
    pad_n = d_out_pad - d_out
    w_p = jnp.pad(w, ((0, 0), (0, pad_n))) if pad_n else w
    b_p = jnp.pad(b, ((0, 0), (0, pad_n))) if pad_n else b
    scale_p = jnp.pad(scale, ((0, 0), (0, pad_n))) if pad_n else scale
    shift_p = jnp.pad(shift, ((0, 0), (0, pad_n))) if pad_n else shift

    b_pad_rows = _round_up(b_rows, tile_b)
    pad_b = b_pad_rows - b_rows
    if pad_b:
        x = jnp.pad(x, ((0, pad_b), (0, 0)))

    # Optional bf16 compute path (MXU accumulates in f32 via preferred_element_type).
    x = x.astype(compute_dtype)
    w_p = w_p.astype(compute_dtype)

    # Constant-index operands are single-buffered when fully resident (n_tiles == 1).
    const_mode = pl.Buffered(1) if (single_buffer_consts and n_tiles == 1) else None

    grid = (b_pad_rows // tile_b, n_tiles)
    kernel = functools.partial(sage_kernel, n_tiles=n_tiles, tile_n=tile_n)
    out = pl.pallas_call(
        kernel,
        out_shape=jax.ShapeDtypeStruct((b_pad_rows, d_out_pad), out_dtype),
        grid=grid,
        in_specs=[
            pl.BlockSpec((tile_b, k_dim), lambda i, j: (i, 0)),           # activations
            _const_spec((k_dim, tile_n), lambda i, j: (0, j), const_mode),  # weight block
            _const_spec((1, tile_n), lambda i, j: (0, j), const_mode),      # bias
            _const_spec((1, tile_n), lambda i, j: (0, j), const_mode),      # BN scale
            _const_spec((1, tile_n), lambda i, j: (0, j), const_mode),      # BN shift
        ],
        # Full-width output block, resident across the (arbitrary) N axis; written
        # back to HBM once per batch tile after the L2-normalize epilogue.
        out_specs=pl.BlockSpec((tile_b, d_out_pad), lambda i, j: (i, 0)),
        compiler_params=pltpu.CompilerParams(
            dimension_semantics=("parallel", "arbitrary"),
            vmem_limit_bytes=vmem_limit,
        ),
    )(x, w_p, b_p, scale_p, shift_p)

    return out[:b_rows, :d_out]


def sage_conv_forward(features, batch, edge_index, params, *,
                      compute_dtype=jnp.bfloat16, out_dtype=jnp.float32,
                      min_n_tiles=1):
    """SAGEConv eval-mode forward. features: [N, Din]; batch: [B] i32; edge_index: [2, E] i32."""
    kwargs = dict(compute_dtype=compute_dtype, out_dtype=out_dtype,
                  min_n_tiles=min_n_tiles)
    try:
        return _forward(features, batch, edge_index, params,
                        single_buffer_consts=True, **kwargs)
    except Exception:
        # pipeline_mode / pl.Buffered(1) not supported by this jax build:
        # retry with default (double) buffering for the resident operands.
        return _forward(features, batch, edge_index, params,
                        single_buffer_consts=False, **kwargs)


def init_params(key, input_dim, output_dim):
    # Deterministic synthetic parameters (shapes match SAGEConv.__init__;
    # weight stored as [2*Din, Dout] so the forward is x @ W + b).
    k_w, k_b, k_g, k_be, k_m, k_v = jax.random.split(key, 6)
    bound = 1.0 / jnp.sqrt(2.0 * input_dim)
    w = jax.random.uniform(k_w, (2 * input_dim, output_dim), jnp.float32, -bound, bound)
    b = jax.random.uniform(k_b, (1, output_dim), jnp.float32, -bound, bound)
    gamma = 1.0 + 0.1 * jax.random.normal(k_g, (1, output_dim), jnp.float32)
    beta = 0.1 * jax.random.normal(k_be, (1, output_dim), jnp.float32)
    run_mean = 0.1 * jax.random.normal(k_m, (1, output_dim), jnp.float32)
    run_var = jnp.abs(1.0 + 0.1 * jax.random.normal(k_v, (1, output_dim), jnp.float32))
    return (w, b, gamma, beta, run_mean, run_var)


def reference_forward(features, batch, edge_index, params):
    # Pure-JAX reference of the same eval-mode forward (sanity check).
    w, b, gamma, beta, run_mean, run_var = params
    sources, targets = edge_index[0], edge_index[1]
    aggregated = jnp.zeros_like(features).at[sources].add(features[targets])
    x = jnp.concatenate([features[batch], aggregated[batch]], axis=1)
    out = x @ w + b
    out = jnp.maximum(out, 0.0)
    out = (out - run_mean) / jnp.sqrt(run_var + 1e-5) * gamma + beta
    norm = jnp.linalg.norm(out, axis=1, keepdims=True)
    return out / (norm + 1e-6)


if __name__ == "__main__":
    input_dim, output_dim = 32, 32
    N, E, B = 64, 128, 16

    key = jax.random.PRNGKey(0)
    k_feat, k_src, k_tgt, k_batch, k_params = jax.random.split(key, 5)

    features = jax.random.normal(k_feat, (N, input_dim), jnp.float32)
    sources = jax.random.randint(k_src, (E,), 0, N, jnp.int32)
    targets = jax.random.randint(k_tgt, (E,), 0, N, jnp.int32)
    edge_index = jnp.stack([sources, targets], axis=0)
    batch = jax.random.randint(k_batch, (B,), 0, N, jnp.int32)

    params = init_params(k_params, input_dim, output_dim)
    ref = reference_forward(features, batch, edge_index, params)

    # 1) f32 compute, f32 output, single resident weight block: strict check.
    out_f32 = jax.block_until_ready(
        sage_conv_forward(features, batch, edge_index, params,
                          compute_dtype=jnp.float32, out_dtype=jnp.float32))
    assert out_f32.shape == (B, output_dim)
    assert jnp.allclose(out_f32, ref, atol=1e-3, rtol=1e-3)

    # 2) f32 compute with forced N-tiling: exercises the streamed-weight path
    #    (resident full-width output + last-step L2-normalize epilogue) used for
    #    large Din*Dout.  Still a strict check.
    out_nt = jax.block_until_ready(
        sage_conv_forward(features, batch, edge_index, params,
                          compute_dtype=jnp.float32, out_dtype=jnp.float32,
                          min_n_tiles=2))
    assert out_nt.shape == (B, output_dim)
    assert jnp.allclose(out_nt, ref, atol=1e-3, rtol=1e-3)

    # 3) Default bf16 MXU path (f32 accumulation) with bf16 output: halves HBM
    #    traffic for activations/weights and output writeback.
    out_bf16 = jax.block_until_ready(
        sage_conv_forward(features, batch, edge_index, params,
                          compute_dtype=jnp.bfloat16, out_dtype=jnp.bfloat16))
    assert out_bf16.shape == (B, output_dim)
    assert jnp.allclose(out_bf16.astype(jnp.float32), ref, atol=3e-2, rtol=3e-2)

    print("KERNEL_OK")
</pallas_src>

<mosaic_0001>
module attributes {stable_mosaic.version = 11 : i64} {
  func.func @sage_kernel(%arg0: i32, %arg1: i32, %arg2: memref<8x64xf32, #tpu.memory_space<vmem>>, %arg3: memref<64x128xf32, #tpu.memory_space<vmem>>, %arg4: memref<1x128xf32, #tpu.memory_space<vmem>>, %arg5: memref<1x128xf32, #tpu.memory_space<vmem>>, %arg6: memref<1x128xf32, #tpu.memory_space<vmem>>, %arg7: memref<8x128xf32, #tpu.memory_space<vmem>>) attributes {dimension_semantics = [#tpu.dimension_semantics<parallel>, #tpu.dimension_semantics<arbitrary>], iteration_bounds = array<i64: 2, 1>, scalar_prefetch = 0 : i64, scratch_operands = 0 : i64, tpu.core_type = #tpu.core_type<tc>, window_params = [{transform_indices = @transform_0, window_bounds = array<i64: 8, 64>}, {pipeline_mode = #tpu.pipeline_mode<synchronous>, transform_indices = @transform_1, window_bounds = array<i64: 64, 128>}, {pipeline_mode = #tpu.pipeline_mode<synchronous>, transform_indices = @transform_2, window_bounds = array<i64: 1, 128>}, {pipeline_mode = #tpu.pipeline_mode<synchronous>, transform_indices = @transform_3, window_bounds = array<i64: 1, 128>}, {pipeline_mode = #tpu.pipeline_mode<synchronous>, transform_indices = @transform_4, window_bounds = array<i64: 1, 128>}, {transform_indices = @transform_5, window_bounds = array<i64: 8, 128>}]} {
    %c0 = arith.constant 0 : index
    %c0_0 = arith.constant 0 : index
    %0 = vector.load %arg2[%c0, %c0_0] : memref<8x64xf32, #tpu.memory_space<vmem>>, vector<8x64xf32>
    %c0_1 = arith.constant 0 : index
    %c0_2 = arith.constant 0 : index
    %1 = vector.load %arg3[%c0_1, %c0_2] : memref<64x128xf32, #tpu.memory_space<vmem>>, vector<64x128xf32>
    %cst = arith.constant dense<0.000000e+00> : vector<8x128xf32>
    %2 = tpu.matmul %0, %1, %cst {dimension_numbers = #tpu.dot_dimension_numbers<[1], [0], [0], [1], [0, 0, 1, 1], [], []>} : vector<8x64xf32>, vector<64x128xf32>, vector<8x128xf32> -> vector<8x128xf32>
    %c0_3 = arith.constant 0 : index
    %c0_4 = arith.constant 0 : index
    %3 = vector.load %arg4[%c0_3, %c0_4] : memref<1x128xf32, #tpu.memory_space<vmem>>, vector<1x128xf32>
    %4 = vector.broadcast %3 : vector<1x128xf32> to vector<8x128xf32>
    %5 = arith.addf %2, %4 : vector<8x128xf32>
    %cst_5 = arith.constant 0.000000e+00 : f32
    %6 = vector.broadcast %cst_5 : f32 to vector<8x128xf32>
    %7 = arith.maximumf %5, %6 : vector<8x128xf32>
    %c0_6 = arith.constant 0 : index
    %c0_7 = arith.constant 0 : index
    %8 = vector.load %arg5[%c0_6, %c0_7] : memref<1x128xf32, #tpu.memory_space<vmem>>, vector<1x128xf32>
    %9 = vector.broadcast %8 : vector<1x128xf32> to vector<8x128xf32>
    %10 = arith.mulf %7, %9 : vector<8x128xf32>
    %c0_8 = arith.constant 0 : index
    %c0_9 = arith.constant 0 : index
    %11 = vector.load %arg6[%c0_8, %c0_9] : memref<1x128xf32, #tpu.memory_space<vmem>>, vector<1x128xf32>
    %12 = vector.broadcast %11 : vector<1x128xf32> to vector<8x128xf32>
    %13 = arith.addf %10, %12 : vector<8x128xf32>
    %14 = arith.mulf %13, %13 : vector<8x128xf32>
    %cst_10 = arith.constant dense<0.000000e+00> : vector<8xf32>
    %15 = vector.multi_reduction <add>, %14, %cst_10 [1] : vector<8x128xf32> to vector<8xf32>
    %16 = vector.shape_cast %15 : vector<8xf32> to vector<8x1xf32>
    %17 = math.sqrt %16 : vector<8x1xf32>
    %cst_11 = arith.constant 9.99999997E-7 : f32
    %18 = vector.broadcast %cst_11 : f32 to vector<8x1xf32>
    %19 = arith.addf %17, %18 : vector<8x1xf32>
    %20 = tpu.reciprocal %19 {approx = true} : vector<8x1xf32> -> vector<8x1xf32>
    %21 = arith.mulf %19, %20 : vector<8x1xf32>
    %cst_12 = arith.constant 2.000000e+00 : f32
    %22 = vector.broadcast %cst_12 : f32 to vector<8x1xf32>
    %23 = arith.subf %22, %21 : vector<8x1xf32>
    %24 = arith.mulf %20, %23 : vector<8x1xf32>
    %25 = vector.broadcast %24 : vector<8x1xf32> to vector<8x128xf32>
    %26 = arith.mulf %13, %25 : vector<8x128xf32>
    %c0_13 = arith.constant 0 : index
    %c0_14 = arith.constant 0 : index
    %27 = vector.load %arg7[%c0_13, %c0_14] : memref<8x128xf32, #tpu.memory_space<vmem>>, vector<8x128xf32>
    tpu.vector_store %arg7[%c0_13, %c0_14], %26 {strides = array<i32>} : memref<8x128xf32, #tpu.memory_space<vmem>>, vector<8x128xf32>,
    return
  }
  func.func @transform_0(%arg0: i32, %arg1: i32) -> (i32, i32) {
    %c0_i32 = arith.constant 0 : i32
    %c0_i32_0 = arith.constant 0 : i32
    return %arg0, %c0_i32 : i32, i32
  }
  func.func @transform_1(%arg0: i32, %arg1: i32) -> (i32, i32) {
    %c0_i32 = arith.constant 0 : i32
    %c0_i32_0 = arith.constant 0 : i32
    return %c0_i32, %arg1 : i32, i32
  }
  func.func @transform_2(%arg0: i32, %arg1: i32) -> (i32, i32) {
    %c0_i32 = arith.constant 0 : i32
    %c0_i32_0 = arith.constant 0 : i32
    return %c0_i32, %arg1 : i32, i32
  }
  func.func @transform_3(%arg0: i32, %arg1: i32) -> (i32, i32) {
    %c0_i32 = arith.constant 0 : i32
    %c0_i32_0 = arith.constant 0 : i32
    return %c0_i32, %arg1 : i32, i32
  }
  func.func @transform_4(%arg0: i32, %arg1: i32) -> (i32, i32) {
    %c0_i32 = arith.constant 0 : i32
    %c0_i32_0 = arith.constant 0 : i32
    return %c0_i32, %arg1 : i32, i32
  }
  func.func @transform_5(%arg0: i32, %arg1: i32) -> (i32, i32) {
    %c0_i32 = arith.constant 0 : i32
    %c0_i32_0 = arith.constant 0 : i32
    return %arg0, %c0_i32 : i32, i32
  }
}

module attributes {stable_mosaic.version = 11 : i64} {
  func.func @sage_kernel(%arg0: i32, %arg1: i32, %arg2: memref<8x64xf32, #tpu.memory_space<vmem>>, %arg3: memref<64x128xf32, #tpu.memory_space<vmem>>, %arg4: memref<1x128xf32, #tpu.memory_space<vmem>>, %arg5: memref<1x128xf32, #tpu.memory_space<vmem>>, %arg6: memref<1x128xf32, #tpu.memory_space<vmem>>, %arg7: memref<8x128xf32, #tpu.memory_space<vmem>>) attributes {dimension_semantics = [#tpu.dimension_semantics<parallel>, #tpu.dimension_semantics<arbitrary>], iteration_bounds = array<i64: 2, 1>, scalar_prefetch = 0 : i64, scratch_operands = 0 : i64, tpu.core_type = #tpu.core_type<tc>, window_params = [{transform_indices = @transform_0, window_bounds = array<i64: 8, 64>}, {transform_indices = @transform_1, window_bounds = array<i64: 64, 128>}, {transform_indices = @transform_2, window_bounds = array<i64: 1, 128>}, {transform_indices = @transform_3, window_bounds = array<i64: 1, 128>}, {transform_indices = @transform_4, window_bounds = array<i64: 1, 128>}, {transform_indices = @transform_5, window_bounds = array<i64: 8, 128>}]} {
    %c0 = arith.constant 0 : index
    %c0_0 = arith.constant 0 : index
    %0 = vector.load %arg2[%c0, %c0_0] : memref<8x64xf32, #tpu.memory_space<vmem>>, vector<8x64xf32>
    %c0_1 = arith.constant 0 : index
    %c0_2 = arith.constant 0 : index
    %1 = vector.load %arg3[%c0_1, %c0_2] : memref<64x128xf32, #tpu.memory_space<vmem>>, vector<64x128xf32>
    %cst = arith.constant dense<0.000000e+00> : vector<8x128xf32>
    %2 = tpu.matmul %0, %1, %cst {dimension_numbers = #tpu.dot_dimension_numbers<[1], [0], [0], [1], [0, 0, 1, 1], [], []>} : vector<8x64xf32>, vector<64x128xf32>, vector<8x128xf32> -> vector<8x128xf32>
    %c0_3 = arith.constant 0 : index
    %c0_4 = arith.constant 0 : index
    %3 = vector.load %arg4[%c0_3, %c0_4] : memref<1x128xf32, #tpu.memory_space<vmem>>, vector<1x128xf32>
    %4 = vector.broadcast %3 : vector<1x128xf32> to vector<8x128xf32>
    %5 = arith.addf %2, %4 : vector<8x128xf32>
    %cst_5 = arith.constant 0.000000e+00 : f32
    %6 = vector.broadcast %cst_5 : f32 to vector<8x128xf32>
    %7 = arith.maximumf %5, %6 : vector<8x128xf32>
    %c0_6 = arith.constant 0 : index
    %c0_7 = arith.constant 0 : index
    %8 = vector.load %arg5[%c0_6, %c0_7] : memref<1x128xf32, #tpu.memory_space<vmem>>, vector<1x128xf32>
    %9 = vector.broadcast %8 : vector<1x128xf32> to vector<8x128xf32>
    %10 = arith.mulf %7, %9 : vector<8x128xf32>
    %c0_8 = arith.constant 0 : index
    %c0_9 = arith.constant 0 : index
    %11 = vector.load %arg6[%c0_8, %c0_9] : memref<1x128xf32, #tpu.memory_space<vmem>>, vector<1x128xf32>
    %12 = vector.broadcast %11 : vector<1x128xf32> to vector<8x128xf32>
    %13 = arith.addf %10, %12 : vector<8x128xf32>
    %14 = arith.mulf %13, %13 : vector<8x128xf32>
    %cst_10 = arith.constant dense<0.000000e+00> : vector<8xf32>
    %15 = vector.multi_reduction <add>, %14, %cst_10 [1] : vector<8x128xf32> to vector<8xf32>
    %16 = vector.shape_cast %15 : vector<8xf32> to vector<8x1xf32>
    %17 = math.sqrt %16 : vector<8x1xf32>
    %cst_11 = arith.constant 9.99999997E-7 : f32
    %18 = vector.broadcast %cst_11 : f32 to vector<8x1xf32>
    %19 = arith.addf %17, %18 : vector<8x1xf32>
    %20 = tpu.reciprocal %19 {approx = true} : vector<8x1xf32> -> vector<8x1xf32>
    %21 = arith.mulf %19, %20 : vector<8x1xf32>
    %cst_12 = arith.constant 2.000000e+00 : f32
    %22 = vector.broadcast %cst_12 : f32 to vector<8x1xf32>
    %23 = arith.subf %22, %21 : vector<8x1xf32>
    %24 = arith.mulf %20, %23 : vector<8x1xf32>
    %25 = vector.broadcast %24 : vector<8x1xf32> to vector<8x128xf32>
    %26 = arith.mulf %13, %25 : vector<8x128xf32>
    %c0_13 = arith.constant 0 : index
    %c0_14 = arith.constant 0 : index
    %27 = vector.load %arg7[%c0_13, %c0_14] : memref<8x128xf32, #tpu.memory_space<vmem>>, vector<8x128xf32>
    tpu.vector_store %arg7[%c0_13, %c0_14], %26 {strides = array<i32>} : memref<8x128xf32, #tpu.memory_space<vmem>>, vector<8x128xf32>,
    return
  }
  func.func @transform_0(%arg0: i32, %arg1: i32) -> (i32, i32) {
    %c0_i32 = arith.constant 0 : i32
    %c0_i32_0 = arith.constant 0 : i32
    return %arg0, %c0_i32 : i32, i32
  }
  func.func @transform_1(%arg0: i32, %arg1: i32) -> (i32, i32) {
    %c0_i32 = arith.constant 0 : i32
    %c0_i32_0 = arith.constant 0 : i32
    return %c0_i32, %arg1 : i32, i32
  }
  func.func @transform_2(%arg0: i32, %arg1: i32) -> (i32, i32) {
    %c0_i32 = arith.constant 0 : i32
    %c0_i32_0 = arith.constant 0 : i32
    return %c0_i32, %arg1 : i32, i32
  }
  func.func @transform_3(%arg0: i32, %arg1: i32) -> (i32, i32) {
    %c0_i32 = arith.constant 0 : i32
    %c0_i32_0 = arith.constant 0 : i32
    return %c0_i32, %arg1 : i32, i32
  }
  func.func @transform_4(%arg0: i32, %arg1: i32) -> (i32, i32) {
    %c0_i32 = arith.constant 0 : i32
    %c0_i32_0 = arith.constant 0 : i32
    return %c0_i32, %arg1 : i32, i32
  }
  func.func @transform_5(%arg0: i32, %arg1: i32) -> (i32, i32) {
    %c0_i32 = arith.constant 0 : i32
    %c0_i32_0 = arith.constant 0 : i32
    return %arg0, %c0_i32 : i32, i32
  }
}

</mosaic_0001>

<bundles_post_ra>
// kernel: _forward.1
= control target key start
LH: loop header
LB: loop body
LE: loop exit
PB: predicated region body
PF: predicated region fallthrough
CT: control target
= control target key end

     0   :  { %10 = vsyncpa [#allocation3], 0  ;;  %s813_s0 = inlined_call_operand.vmem [shape: f32[16,64], index: 0, kind: input, shape index: {}]   ;;  %s814_s1 = inlined_call_operand.vmem [shape: f32[64,128], index: 1, kind: input, shape index: {}]   ;;  %s815_s2 = inlined_call_operand.vmem [shape: f32[1,128], index: 2, kind: input, shape index: {}]   ;;  %s816_s3 = inlined_call_operand.vmem [shape: f32[1,128], index: 3, kind: input, shape index: {}]   ;;  %s817_s4 = inlined_call_operand.vmem [shape: f32[1,128], index: 4, kind: input, shape index: {}]   ;;  %s818_s5 = inlined_call_operand.hbm [shape: f32[16,128], index: 5, kind: output, shape index: {}]  }
   0x1   :  { %12 = vsyncpa [#allocation3 + $0x1], 0  ;;  %s683_s18 = smov 0   ;;  %s685_s19 = smov 0  }
   0x2   :  { %s687_s20 = smov 0   ;;  %s689_s21 = smov 0  }
   0x3   :  { %s691_s22 = smov 0   ;;  %s693_s23 = smov 0  }
   0x4 LB: > { %s495_s24 = sadd.s32 4294967295, %s651_s23   ;;  %s496_s25 = sadd.s32 4294967294, %s651_s23   ;;  %s651_s23 = sphi %s693_s23, %s18_s23   ;;  %s647_s22 = sphi %s691_s22, %s825_s22   ;;  %s643_s21 = sphi %s689_s21, %s824_s21   ;;  %s639_s20 = sphi %s687_s20, %s823_s20   ;;  %s635_s19 = sphi %s685_s19, %s822_s19   ;;  %s631_s18 = sphi %s683_s18, %s821_s18  }
   0x5   : > { %s30_s26 = sadd.s32 1, %s647_s22  ;;  %s167_s27 = sadd.s32 1, %s639_s20 }
   0x6   : > { %p32_p0 = scmp.ge.s32.totalorder %s30_s26, 2  ;;  %p177_p1 = scmp.ne.s32.totalorder %s639_s20, %s635_s19 }
   0x7   : > { %p178_p2 = scmp.eq.s32.totalorder %s495_s24, 1  ;;  %p183_p3 = scmp.ne.s32.totalorder %s635_s19, %s631_s18 }
   0x8   : > { %s827_s26 = smov (%p32_p0, %s30_s26), 0  ;;  %p184_p5 = scmp.eq.s32.totalorder %s496_s25, 1 }
   0x9   : > { %p723_p4 = por %p178_p2, %p177_p1  ;;  %s164_s29 = ssub.s32 %s647_s22, %s827_s26 }
   0xa   : > { %p503_p6 = scmp.ge.s32.totalorder %s651_s23, 1  ;;  %p165_p7 = scmp.eq.s32.totalorder %s164_s29, 0 }
   0xb   : > { %p730_p8 = por %p184_p5, %p183_p3  ;;  %p234_p9 = scmp.lt.s32.totalorder %s651_s23, 3 }
   0xc   : > { %s736_s6 = scalar_select %p165_p7, %s639_s20, %s167_s27  }
   0xd   : > { %p235_p10 = pnand %p503_p6, %p234_p9 }
   0xe   : > { %p274_p11 = scmp.lt.s32.totalorder (!%p235_p10), %s643_s21, 1  ;;  %s271_s25 = sand.u32 (!%p235_p10), 1, %s635_s19  }
   0xf   : > { %238 = sbr.rel (%p235_p10) target bundleno = 329 (0x149), region = 40  ;;  %s504_s27 = sshll.u32 (!%p235_p10), %s271_s25, 3 }
  0x10   : > { %s508_s29 = sshll.u32 (!%p235_p10), %s643_s21, 3  ;;  %s593_s17 = scalar_lea.hbm (!%p235_p10), %s818_s5, 16 }
  0x11   : > { %s372_s9 = scalar_lea.hbm (!%p235_p10), %s818_s5, %s508_s29 }
  0x12   : > { %s376_s12 = sshll.u32 (!%p235_p10), %s372_s9, 4  ;;  %s377_s12 = int_to_ptr.hbm [resolvable:$true] %s376_s12 }
  0x13   : > { %s587_s14 = sshra.s32 (!%p235_p10), %s377_s12, 4  ;;  %s588_s14 = int_to_ptr.hbm [resolvable:$true] %s587_s14 }
  0x14   : > { %v299_v0 = vld [vmem:[%s814_s1 + $0x38] sm:$0xff]  ;;  %v298_v1 = vld [vmem:[%s814_s1 + $0x30] sm:$0xff]  ;;  %v297_v2 = vld [vmem:[%s814_s1 + $0x28] sm:$0xff]  ;;  %s275_s13 = scalar_select %p274_p11, %s643_s21, 1  ;;  %vm304_vm0 = vcmask 523264  }
  0x15   : > { %316 = vmatpush.msra.mxu0 %v299_v0  ;;  %v296_v3 = vld [vmem:[%s814_s1 + $0x20] sm:$0xff]  ;;  %v295_v4 = vld [vmem:[%s814_s1 + $0x18] sm:$0xff]  ;;  %v294_v5 = vld [vmem:[%s814_s1 + $0x10] sm:$0xff]  ;;  %s589_s21 = scalar_lea.hbm %s588_s14, 8  ;;  %p594_p1 = scmp.lt.s32.totalorder %s588_s14, %s818_s5 }
  0x16   : > { %s505_s24 = sshll.u32 %s275_s13, 3  ;;  %v293_v6 = vld [vmem:[%s814_s1 + $0x8] sm:$0xff]  ;;  %v292_v7 = vld [vmem:[%s814_s1] sm:$0xff]  ;;  %s362_s13 = scalar_lea.sflag [#allocation3], %s271_s25 }
  0x17   : > { %317 = vmatpush.msra.mxu0 %v298_v1  ;;  %s277_s10 = scalar_lea.vmem %s813_s0, %s505_s24  ;;  %v566_v9 = vld [vmem:[%s815_s2] ss:$0 sm:$0xff]  ;;  %p590_p12 = scmp.ne.s32.totalorder %s588_s14, %s589_s21 }
  0x18   : > { %v291_v8 = vld [vmem:[%s277_s10] sm:$0xff]  ;;  %s273_s10 = scalar_lea.vmem [#allocation2], %s504_s27  ;;  %p595_p2 = scmp.lt.s32.totalorder %s593_s17, %s589_s21 }
  0x19   : > { %318 = vmatpush.msra.mxu0 %v297_v2  ;;  %v567_v12 = vld [vmem:[%s816_s3] ss:$0 sm:$0xff]  ;;  %s374_s11 = sshll.u32 %s273_s10, 4  ;;  %p591_p13 = pnand %p590_p12, %p723_p4  ;;  %s375_s11 = int_to_ptr.vmem [resolvable:$true] %s374_s11 }
  0x1a   : > { %v568_v14 = vld [vmem:[%s817_s4] ss:$0 sm:$0xff]  ;;  %p596_p3 = por %p595_p2, %p594_p1 }
  0x1b   : > { %319 = vmatpush.msra.mxu0 %v296_v3  ;;  %p592_p0 = pneg %p591_p13 }
  0x1d   : > { %320 = vmatpush.msra.mxu0 %v295_v4  ;;  %p597_p5 = pnand %p596_p3, %p592_p0 }
  0x1f   : > { %321 = vmatpush.msra.mxu0 %v294_v5 }
  0x21   : > { %322 = vmatpush.msra.mxu0 %v293_v6 }
  0x23   : > { %323 = vmatpush.msra.mxu0 %v292_v7 }
  0x24   : > { %506 = vmatmul.msk.f32.vlgmr.msra.gmra.mxu0 %vm304_vm0, %v291_v8 }
  0xa1   : > { %v325_v10 = vpop.f32.mrf.mxu0 }
  0xa2   : > { %v326_v11 = vadd.f32 %v566_v9, %v325_v10 }
  0xa4   : > { %v328_v13 = vmax.f32 %v326_v11, 0.0 }
  0xa6   : > { %v333_v15 = vmul.f32 %v567_v12, %v328_v13 }
  0xa8   : > { %v338_v16 = vadd.f32 %v568_v14, %v333_v15 }
  0xaa   : > { %v339_v17 = vmul.f32 %v338_v16, %v338_v16 }
  0xac   : > { %340 = vadd.xlane.f32.xlu0 %v339_v17 }
 0x11f   : > { %v341_v18 = vpop.xlane.xlu0 %340 }
 0x120   : > { %569 = vrsqrt.f32 %v341_v18  ;;  %vm349_vm1 = vcmp.eq.f32.partialorder %v341_v18, inf  ;;  %v352_v26 = vand.u32 2147483648, %v341_v18  ;;  %vm351_vm2 = vcmp.eq.f32.partialorder %v341_v18, 0.0 }
 0x126   : > { %v570_v19 = vpop.eup %569 }
 0x127   : > { %v343_v20 = vmul.f32 %v570_v19, %v341_v18 }
 0x129   : > { %v344_v21 = vmul.f32 %v570_v19, %v343_v20 }
 0x12b   : > { %v345_v22 = vmul.f32 0.5, %v344_v21 }
 0x12d   : > { %v346_v23 = vsub.f32 1.5, %v345_v22 }
 0x12f   : > { %v347_v24 = vmul.f32 %v570_v19, %v346_v23 }
 0x131   : > { %v348_v25 = vmul.f32 %v347_v24, %v341_v18 }
 0x133   : > { %v350_v27 = vsel %vm349_vm1, %v341_v18, %v348_v25 }
 0x134   : > { %v353_v28 = vsel %vm351_vm2, %v352_v26, %v350_v27 }
 0x135   : > { %v354_v29 = vadd.f32 1e-06, %v353_v28 }
 0x137   : > { %571 = vrcp.f32 %v354_v29 }
 0x13d   : > { %v572_v30 = vpop.eup %571 }
 0x13e   : > { %v356_v31 = vmul.f32 %v572_v30, %v354_v29 }
 0x140   : > { %v357_v32 = vsub.f32 2.0, %v356_v31 }
 0x142   : > { %v358_v33 = vmul.f32 %v572_v30, %v357_v32 }
 0x144   : > { %v359_v34 = vmul.f32 %v358_v33, %v338_v16 }
 0x146   : > { %360 = vst [vmem:[%s273_s10] sm:$0xff] %v359_v34 }
 0x147   : > { %600 = shalt.err (!%p597_p5)
}
 0x148   : > { %511 = dma.vmem_to_hbm [thread:$0]  (%p723_p4), %s375_s11, 128, %s377_s12, %s362_s13  }
 0x149 PF: > { %p517_p6 = scmp.ge.s32.totalorder %s651_s23, 2  ;;  %s388_s25 = sand.u32 1, %s631_s18  }
 0x14a   : > { %s389_s29 = scalar_lea.sflag [#allocation3], %s388_s25 }
 0x14b   : > { %p514_p7 = pnand %p517_p6, %p730_p8 }
 0x14d   : > { %p515_p9 = pneg %p514_p7 }
 0x14f   : > { %626 = dma.done.wait (%p515_p9), %s389_s29, 128  }
 0x150   : > { %628 = vsyncadd (%p515_p9), %s389_s29, 4294967168  ;;  %s18_s23 = sadd.s32 1, %s651_s23   ;;  %s821_s18 = smov %s635_s19 }
 0x151   : > { %p15_p10 = scmp.ge.s32.totalorder %s18_s23, 4   ;;  %s822_s19 = smov %s639_s20 }
 0x152   : > { %s823_s20 = smov %s736_s6  ;;  %s824_s21 = smov %s647_s22 }
 0x153   : > { %s825_s22 = smov %s827_s26  ;;  %17 = sbr.rel (!%p15_p10) target bundleno = 4 (0x4), region = 87 }
 0x158   :  { %395 = vsyncpa [#allocation3], 1 }
 0x159   :  { %397 = vsyncpa [#allocation3 + $0x1], 1 }

// kernel: _forward.1
= control target key start
LH: loop header
LB: loop body
LE: loop exit
PB: predicated region body
PF: predicated region fallthrough
CT: control target
= control target key end

     0   :  { %10 = vsyncpa [#allocation3], 0  ;;  %s813_s0 = inlined_call_operand.vmem [shape: f32[16,64], index: 0, kind: input, shape index: {}]   ;;  %s814_s1 = inlined_call_operand.vmem [shape: f32[64,128], index: 1, kind: input, shape index: {}]   ;;  %s815_s2 = inlined_call_operand.vmem [shape: f32[1,128], index: 2, kind: input, shape index: {}]   ;;  %s816_s3 = inlined_call_operand.vmem [shape: f32[1,128], index: 3, kind: input, shape index: {}]   ;;  %s817_s4 = inlined_call_operand.vmem [shape: f32[1,128], index: 4, kind: input, shape index: {}]   ;;  %s818_s5 = inlined_call_operand.hbm [shape: f32[16,128], index: 5, kind: output, shape index: {}]  }
   0x1   :  { %12 = vsyncpa [#allocation3 + $0x1], 0  ;;  %s683_s18 = smov 0   ;;  %s685_s19 = smov 0  }
   0x2   :  { %s687_s20 = smov 0   ;;  %s689_s21 = smov 0  }
   0x3   :  { %s691_s22 = smov 0   ;;  %s693_s23 = smov 0  }
   0x4 LB: > { %s495_s24 = sadd.s32 4294967295, %s651_s23   ;;  %s496_s25 = sadd.s32 4294967294, %s651_s23   ;;  %s651_s23 = sphi %s693_s23, %s18_s23   ;;  %s647_s22 = sphi %s691_s22, %s825_s22   ;;  %s643_s21 = sphi %s689_s21, %s824_s21   ;;  %s639_s20 = sphi %s687_s20, %s823_s20   ;;  %s635_s19 = sphi %s685_s19, %s822_s19   ;;  %s631_s18 = sphi %s683_s18, %s821_s18  }
   0x5   : > { %s30_s26 = sadd.s32 1, %s647_s22  ;;  %s167_s27 = sadd.s32 1, %s639_s20 }
   0x6   : > { %p32_p0 = scmp.ge.s32.totalorder %s30_s26, 2  ;;  %p177_p1 = scmp.ne.s32.totalorder %s639_s20, %s635_s19 }
   0x7   : > { %p178_p2 = scmp.eq.s32.totalorder %s495_s24, 1  ;;  %p183_p3 = scmp.ne.s32.totalorder %s635_s19, %s631_s18 }
   0x8   : > { %s827_s26 = smov (%p32_p0, %s30_s26), 0  ;;  %p184_p5 = scmp.eq.s32.totalorder %s496_s25, 1 }
   0x9   : > { %p723_p4 = por %p178_p2, %p177_p1  ;;  %s164_s29 = ssub.s32 %s647_s22, %s827_s26 }
   0xa   : > { %p503_p6 = scmp.ge.s32.totalorder %s651_s23, 1  ;;  %p165_p7 = scmp.eq.s32.totalorder %s164_s29, 0 }
   0xb   : > { %p730_p8 = por %p184_p5, %p183_p3  ;;  %p234_p9 = scmp.lt.s32.totalorder %s651_s23, 3 }
   0xc   : > { %s736_s6 = scalar_select %p165_p7, %s639_s20, %s167_s27  }
   0xd   : > { %p235_p10 = pnand %p503_p6, %p234_p9 }
   0xe   : > { %p274_p11 = scmp.lt.s32.totalorder (!%p235_p10), %s643_s21, 1  ;;  %s271_s25 = sand.u32 (!%p235_p10), 1, %s635_s19  }
   0xf   : > { %238 = sbr.rel (%p235_p10) target bundleno = 329 (0x149), region = 40  ;;  %s504_s27 = sshll.u32 (!%p235_p10), %s271_s25, 3 }
  0x10   : > { %s508_s29 = sshll.u32 (!%p235_p10), %s643_s21, 3  ;;  %s593_s17 = scalar_lea.hbm (!%p235_p10), %s818_s5, 16 }
  0x11   : > { %s372_s9 = scalar_lea.hbm (!%p235_p10), %s818_s5, %s508_s29 }
  0x12   : > { %s376_s12 = sshll.u32 (!%p235_p10), %s372_s9, 4  ;;  %s377_s12 = int_to_ptr.hbm [resolvable:$true] %s376_s12 }
  0x13   : > { %s587_s14 = sshra.s32 (!%p235_p10), %s377_s12, 4  ;;  %s588_s14 = int_to_ptr.hbm [resolvable:$true] %s587_s14 }
  0x14   : > { %v299_v0 = vld [vmem:[%s814_s1 + $0x38] sm:$0xff]  ;;  %v298_v1 = vld [vmem:[%s814_s1 + $0x30] sm:$0xff]  ;;  %v297_v2 = vld [vmem:[%s814_s1 + $0x28] sm:$0xff]  ;;  %s275_s13 = scalar_select %p274_p11, %s643_s21, 1  ;;  %vm304_vm0 = vcmask 523264  }
  0x15   : > { %316 = vmatpush.msra.mxu0 %v299_v0  ;;  %v296_v3 = vld [vmem:[%s814_s1 + $0x20] sm:$0xff]  ;;  %v295_v4 = vld [vmem:[%s814_s1 + $0x18] sm:$0xff]  ;;  %v294_v5 = vld [vmem:[%s814_s1 + $0x10] sm:$0xff]  ;;  %s589_s21 = scalar_lea.hbm %s588_s14, 8  ;;  %p594_p1 = scmp.lt.s32.totalorder %s588_s14, %s818_s5 }
  0x16   : > { %s505_s24 = sshll.u32 %s275_s13, 3  ;;  %v293_v6 = vld [vmem:[%s814_s1 + $0x8] sm:$0xff]  ;;  %v292_v7 = vld [vmem:[%s814_s1] sm:$0xff]  ;;  %s362_s13 = scalar_lea.sflag [#allocation3], %s271_s25 }
  0x17   : > { %317 = vmatpush.msra.mxu0 %v298_v1  ;;  %s277_s10 = scalar_lea.vmem %s813_s0, %s505_s24  ;;  %v566_v9 = vld [vmem:[%s815_s2] ss:$0 sm:$0xff]  ;;  %p590_p12 = scmp.ne.s32.totalorder %s588_s14, %s589_s21 }
  0x18   : > { %v291_v8 = vld [vmem:[%s277_s10] sm:$0xff]  ;;  %s273_s10 = scalar_lea.vmem [#allocation2], %s504_s27  ;;  %p595_p2 = scmp.lt.s32.totalorder %s593_s17, %s589_s21 }
  0x19   : > { %318 = vmatpush.msra.mxu0 %v297_v2  ;;  %v567_v12 = vld [vmem:[%s816_s3] ss:$0 sm:$0xff]  ;;  %s374_s11 = sshll.u32 %s273_s10, 4  ;;  %p591_p13 = pnand %p590_p12, %p723_p4  ;;  %s375_s11 = int_to_ptr.vmem [resolvable:$true] %s374_s11 }
  0x1a   : > { %v568_v14 = vld [vmem:[%s817_s4] ss:$0 sm:$0xff]  ;;  %p596_p3 = por %p595_p2, %p594_p1 }
  0x1b   : > { %319 = vmatpush.msra.mxu0 %v296_v3  ;;  %p592_p0 = pneg %p591_p13 }
  0x1d   : > { %320 = vmatpush.msra.mxu0 %v295_v4  ;;  %p597_p5 = pnand %p596_p3, %p592_p0 }
  0x1f   : > { %321 = vmatpush.msra.mxu0 %v294_v5 }
  0x21   : > { %322 = vmatpush.msra.mxu0 %v293_v6 }
  0x23   : > { %323 = vmatpush.msra.mxu0 %v292_v7 }
  0x24   : > { %506 = vmatmul.msk.f32.vlgmr.msra.gmra.mxu0 %vm304_vm0, %v291_v8 }
  0xa1   : > { %v325_v10 = vpop.f32.mrf.mxu0 }
  0xa2   : > { %v326_v11 = vadd.f32 %v566_v9, %v325_v10 }
  0xa4   : > { %v328_v13 = vmax.f32 %v326_v11, 0.0 }
  0xa6   : > { %v333_v15 = vmul.f32 %v567_v12, %v328_v13 }
  0xa8   : > { %v338_v16 = vadd.f32 %v568_v14, %v333_v15 }
  0xaa   : > { %v339_v17 = vmul.f32 %v338_v16, %v338_v16 }
  0xac   : > { %340 = vadd.xlane.f32.xlu0 %v339_v17 }
 0x11f   : > { %v341_v18 = vpop.xlane.xlu0 %340 }
 0x120   : > { %569 = vrsqrt.f32 %v341_v18  ;;  %vm349_vm1 = vcmp.eq.f32.partialorder %v341_v18, inf  ;;  %v352_v26 = vand.u32 2147483648, %v341_v18  ;;  %vm351_vm2 = vcmp.eq.f32.partialorder %v341_v18, 0.0 }
 0x126   : > { %v570_v19 = vpop.eup %569 }
 0x127   : > { %v343_v20 = vmul.f32 %v570_v19, %v341_v18 }
 0x129   : > { %v344_v21 = vmul.f32 %v570_v19, %v343_v20 }
 0x12b   : > { %v345_v22 = vmul.f32 0.5, %v344_v21 }
 0x12d   : > { %v346_v23 = vsub.f32 1.5, %v345_v22 }
 0x12f   : > { %v347_v24 = vmul.f32 %v570_v19, %v346_v23 }
 0x131   : > { %v348_v25 = vmul.f32 %v347_v24, %v341_v18 }
 0x133   : > { %v350_v27 = vsel %vm349_vm1, %v341_v18, %v348_v25 }
 0x134   : > { %v353_v28 = vsel %vm351_vm2, %v352_v26, %v350_v27 }
 0x135   : > { %v354_v29 = vadd.f32 1e-06, %v353_v28 }
 0x137   : > { %571 = vrcp.f32 %v354_v29 }
 0x13d   : > { %v572_v30 = vpop.eup %571 }
 0x13e   : > { %v356_v31 = vmul.f32 %v572_v30, %v354_v29 }
 0x140   : > { %v357_v32 = vsub.f32 2.0, %v356_v31 }
 0x142   : > { %v358_v33 = vmul.f32 %v572_v30, %v357_v32 }
 0x144   : > { %v359_v34 = vmul.f32 %v358_v33, %v338_v16 }
 0x146   : > { %360 = vst [vmem:[%s273_s10] sm:$0xff] %v359_v34 }
 0x147   : > { %600 = shalt.err (!%p597_p5)
}
 0x148   : > { %511 = dma.vmem_to_hbm [thread:$0]  (%p723_p4), %s375_s11, 128, %s377_s12, %s362_s13  }
 0x149 PF: > { %p517_p6 = scmp.ge.s32.totalorder %s651_s23, 2  ;;  %s388_s25 = sand.u32 1, %s631_s18  }
 0x14a   : > { %s389_s29 = scalar_lea.sflag [#allocation3], %s388_s25 }
 0x14b   : > { %p514_p7 = pnand %p517_p6, %p730_p8 }
 0x14d   : > { %p515_p9 = pneg %p514_p7 }
 0x14f   : > { %626 = dma.done.wait (%p515_p9), %s389_s29, 128  }
 0x150   : > { %628 = vsyncadd (%p515_p9), %s389_s29, 4294967168  ;;  %s18_s23 = sadd.s32 1, %s651_s23   ;;  %s821_s18 = smov %s635_s19 }
 0x151   : > { %p15_p10 = scmp.ge.s32.totalorder %s18_s23, 4   ;;  %s822_s19 = smov %s639_s20 }
 0x152   : > { %s823_s20 = smov %s736_s6  ;;  %s824_s21 = smov %s647_s22 }
 0x153   : > { %s825_s22 = smov %s827_s26  ;;  %17 = sbr.rel (!%p15_p10) target bundleno = 4 (0x4), region = 87 }
 0x158   :  { %395 = vsyncpa [#allocation3], 1 }
 0x159   :  { %397 = vsyncpa [#allocation3 + $0x1], 1 }

</bundles_post_ra>
